<compile_context>
chip_gen: v5e
topology: v5e:2x2
jax: 0.10.0
libtpu: 0.0.40
codegen_flags: <defaults>
</compile_context>

<pallas_src>
import functools

import jax
import jax.numpy as jnp
from jax.experimental import pallas as pl
from jax.experimental.pallas import tpu as pltpu

LANES = 128


def linear_kernel(x_ref, wt_ref, b_ref, o_ref):
    """Fused linear o = x @ wt + b, computed on the VPU only (no MXU pass).

    x_ref:  (N, K)        f32
    wt_ref: (K, OUT_PAD)  f32  (pre-transposed + lane-padded at init)
    b_ref:  (1, OUT_PAD)  f32  (lane-padded at init)
    o_ref:  (N, OUT_PAD)  f32  -> one lane-dense (8,128) unmasked store at N=8
    """
    n = x_ref.shape[0]
    k_dim = x_ref.shape[1]
    out_pad = o_ref.shape[1]

    x = x_ref[...]
    wt = wt_ref[...]

    # Hoist every broadcast off the serial accumulate chain so they can all be
    # issued up front / co-issued; the dependent path is then just K=4 FMAs.
    x_cols = [jnp.broadcast_to(x[:, k:k + 1], (n, out_pad)) for k in range(k_dim)]
    w_rows = [jnp.broadcast_to(wt[k:k + 1, :], (n, out_pad)) for k in range(k_dim)]

    acc = jnp.broadcast_to(b_ref[...], (n, out_pad)).astype(jnp.float32)
    for k in range(k_dim):          # K=4: fully unrolled VPU multiply-adds
        acc = acc + x_cols[k] * w_rows[k]
    o_ref[...] = acc.astype(o_ref.dtype)


def prepare_params(weight, bias, lanes=LANES):
    """One-time (init-time) parameter prep — keeps layout work off the hot path.

    weight: (out_f, in_f)  PyTorch nn.Linear layout
    bias:   (out_f,)
    Returns lane-padded wt: (in_f, out_pad) and b2: (1, out_pad), out_pad = 128,
    so the kernel's weight/bias vregs and output store are lane-dense.
    """
    out_f, in_f = weight.shape
    out_pad = ((out_f + lanes - 1) // lanes) * lanes
    wt = jnp.zeros((in_f, out_pad), weight.dtype).at[:, :out_f].set(weight.T)
    b2 = jnp.zeros((1, out_pad), bias.dtype).at[:, :out_f].set(bias)
    return wt, b2


@functools.partial(jax.jit, static_argnames=("out_features",))
def softmax_classifier_forward(x, wt_pad, b_pad, out_features):
    """logits = x @ W.T + b, via a grid-less, VMEM-resident Pallas kernel."""
    n, in_f = x.shape
    out_pad = wt_pad.shape[1]
    vmem = pl.BlockSpec(memory_space=pltpu.MemorySpace.VMEM)
    logits_pad = pl.pallas_call(
        linear_kernel,
        out_shape=jax.ShapeDtypeStruct((n, out_pad), x.dtype),
        in_specs=[vmem, vmem, vmem],
        out_specs=vmem,
        cost_estimate=pl.CostEstimate(
            flops=2 * n * in_f * out_pad,
            transcendentals=0,
            bytes_accessed=4 * (n * in_f + in_f * out_pad + out_pad + n * out_pad),
        ),
    )(x, wt_pad, b_pad)
    # Un-pad to the model's true out_features; fused (free) slice under jit.
    return logits_pad[:, :out_features]


if __name__ == "__main__":
    key = jax.random.PRNGKey(0)
    kx, kw, kb = jax.random.split(key, 3)

    N, IN_F, OUT_F = 8, 4, 3
    x = jax.random.normal(kx, (N, IN_F), dtype=jnp.float32)
    # Deterministic init mimicking nn.Linear's uniform(-1/sqrt(in), 1/sqrt(in)).
    bound = 1.0 / jnp.sqrt(jnp.float32(IN_F))
    weight = jax.random.uniform(kw, (OUT_F, IN_F), dtype=jnp.float32,
                                minval=-bound, maxval=bound)
    bias = jax.random.uniform(kb, (OUT_F,), dtype=jnp.float32,
                              minval=-bound, maxval=bound)

    # One-time parameter preparation (init time), not per-forward.
    wt_pad, b_pad = prepare_params(weight, bias)

    out = softmax_classifier_forward(x, wt_pad, b_pad, OUT_F)
    jax.block_until_ready(out)

    # Correctness check against a plain JAX reference of the PyTorch forward.
    ref = x @ weight.T + bias
    assert out.shape == (N, OUT_F)
    assert jnp.allclose(out, ref, atol=1e-5, rtol=1e-5)

    print("KERNEL_OK")
</pallas_src>

<mosaic_0001>
module attributes {stable_mosaic.version = 11 : i64} {
  func.func @linear_kernel(%arg0: memref<8x4xf32, #tpu.memory_space<vmem>>, %arg1: memref<4x128xf32, #tpu.memory_space<vmem>>, %arg2: memref<1x128xf32, #tpu.memory_space<vmem>>, %arg3: memref<8x128xf32, #tpu.memory_space<vmem>>) attributes {dimension_semantics = [], scalar_prefetch = 0 : i64, scratch_operands = 0 : i64, tpu.core_type = #tpu.core_type<tc>} {
    %c0 = arith.constant 0 : index
    %c0_0 = arith.constant 0 : index
    %0 = vector.load %arg0[%c0, %c0_0] : memref<8x4xf32, #tpu.memory_space<vmem>>, vector<8x4xf32>
    %c0_1 = arith.constant 0 : index
    %c0_2 = arith.constant 0 : index
    %1 = vector.load %arg1[%c0_1, %c0_2] : memref<4x128xf32, #tpu.memory_space<vmem>>, vector<4x128xf32>
    %2 = vector.extract_strided_slice %0 {offsets = [0, 0], sizes = [8, 1], strides = [1, 1]} : vector<8x4xf32> to vector<8x1xf32>
    %3 = vector.shape_cast %2 : vector<8x1xf32> to vector<8x1xf32>
    %4 = vector.broadcast %3 : vector<8x1xf32> to vector<8x128xf32>
    %5 = vector.extract_strided_slice %0 {offsets = [0, 1], sizes = [8, 1], strides = [1, 1]} : vector<8x4xf32> to vector<8x1xf32>
    %6 = vector.shape_cast %5 : vector<8x1xf32> to vector<8x1xf32>
    %7 = vector.broadcast %6 : vector<8x1xf32> to vector<8x128xf32>
    %8 = vector.extract_strided_slice %0 {offsets = [0, 2], sizes = [8, 1], strides = [1, 1]} : vector<8x4xf32> to vector<8x1xf32>
    %9 = vector.shape_cast %8 : vector<8x1xf32> to vector<8x1xf32>
    %10 = vector.broadcast %9 : vector<8x1xf32> to vector<8x128xf32>
    %11 = vector.extract_strided_slice %0 {offsets = [0, 3], sizes = [8, 1], strides = [1, 1]} : vector<8x4xf32> to vector<8x1xf32>
    %12 = vector.shape_cast %11 : vector<8x1xf32> to vector<8x1xf32>
    %13 = vector.broadcast %12 : vector<8x1xf32> to vector<8x128xf32>
    %14 = vector.extract_strided_slice %1 {offsets = [0, 0], sizes = [1, 128], strides = [1, 1]} : vector<4x128xf32> to vector<1x128xf32>
    %15 = vector.shape_cast %14 : vector<1x128xf32> to vector<1x128xf32>
    %16 = vector.broadcast %15 : vector<1x128xf32> to vector<8x128xf32>
    %17 = vector.extract_strided_slice %1 {offsets = [1, 0], sizes = [1, 128], strides = [1, 1]} : vector<4x128xf32> to vector<1x128xf32>
    %18 = vector.shape_cast %17 : vector<1x128xf32> to vector<1x128xf32>
    %19 = vector.broadcast %18 : vector<1x128xf32> to vector<8x128xf32>
    %20 = vector.extract_strided_slice %1 {offsets = [2, 0], sizes = [1, 128], strides = [1, 1]} : vector<4x128xf32> to vector<1x128xf32>
    %21 = vector.shape_cast %20 : vector<1x128xf32> to vector<1x128xf32>
    %22 = vector.broadcast %21 : vector<1x128xf32> to vector<8x128xf32>
    %23 = vector.extract_strided_slice %1 {offsets = [3, 0], sizes = [1, 128], strides = [1, 1]} : vector<4x128xf32> to vector<1x128xf32>
    %24 = vector.shape_cast %23 : vector<1x128xf32> to vector<1x128xf32>
    %25 = vector.broadcast %24 : vector<1x128xf32> to vector<8x128xf32>
    %c0_3 = arith.constant 0 : index
    %c0_4 = arith.constant 0 : index
    %26 = vector.load %arg2[%c0_3, %c0_4] : memref<1x128xf32, #tpu.memory_space<vmem>>, vector<1x128xf32>
    %27 = vector.shape_cast %26 : vector<1x128xf32> to vector<1x128xf32>
    %28 = vector.broadcast %27 : vector<1x128xf32> to vector<8x128xf32>
    %29 = arith.mulf %4, %16 : vector<8x128xf32>
    %30 = arith.addf %28, %29 : vector<8x128xf32>
    %31 = arith.mulf %7, %19 : vector<8x128xf32>
    %32 = arith.addf %30, %31 : vector<8x128xf32>
    %33 = arith.mulf %10, %22 : vector<8x128xf32>
    %34 = arith.addf %32, %33 : vector<8x128xf32>
    %35 = arith.mulf %13, %25 : vector<8x128xf32>
    %36 = arith.addf %34, %35 : vector<8x128xf32>
    %c0_5 = arith.constant 0 : index
    %c0_6 = arith.constant 0 : index
    %37 = vector.load %arg3[%c0_5, %c0_6] : memref<8x128xf32, #tpu.memory_space<vmem>>, vector<8x128xf32>
    tpu.vector_store %arg3[%c0_5, %c0_6], %36 {strides = array<i32>} : memref<8x128xf32, #tpu.memory_space<vmem>>, vector<8x128xf32>,
    return
  }
}

</mosaic_0001>

<bundles_post_ra>
// kernel: softmax_classifier_forward.1
= control target key start
LH: loop header
LB: loop body
LE: loop exit
PB: predicated region body
PF: predicated region fallthrough
CT: control target
= control target key end

     0   :  { %v64_v0 = vmov 0   ;;  %v65_v2 = vmov 2   ;;  %v66_v3 = vmov 1   ;;  %v67_v4 = vmov 3   ;;  %s100_s0 = inlined_call_operand.vmem [shape: f32[8,4], index: 0, kind: input, shape index: {}]   ;;  %s101_s2 = inlined_call_operand.vmem [shape: f32[1,128], index: 2, kind: input, shape index: {}]   ;;  %s102_s1 = inlined_call_operand.vmem [shape: f32[4,128], index: 1, kind: input, shape index: {}]   ;;  %s103_s3 = inlined_call_operand.vmem [shape: f32[8,128], index: 3, kind: output, shape index: {}]  }
   0x1   :  { %58 = vset.pattern.permute.xlu0 %v64_v0  ;;  %v14_v1 = vld [vmem:[%s100_s0] sm:$0xff]  ;;  %60 = vset.pattern.permute.xlu1 %v65_v2 }
   0x2   :  { %18 = vperm.xlu0 %58, %v14_v1   ;;  %26 = vperm.xlu1 %60, %v14_v1   ;;  %v15_v5 = vld [vmem:[%s102_s1] sm:$0xf] }
   0x3   :  { %v33_v8 = vperm.slane %v15_v5, 0  ;;  %v63_v9 = vld [vmem:[%s101_s2] ss:$0 sm:$0xff]  ;;  %v34_v11 = vperm.slane %v15_v5, 1  ;;  %v35_v12 = vperm.slane %v15_v5, 2  ;;  %v36_v13 = vperm.slane %v15_v5, 3 }
   0xa   :  { %59 = vset.pattern.permute.xlu0 %v66_v3  ;;  %61 = vset.pattern.permute.xlu1 %v67_v4 }
   0xb   :  { %22 = vperm.xlu0 %59, %v14_v1   ;;  %30 = vperm.xlu1 %61, %v14_v1  }
  0x13   :  { %62 = vset.pattern.permute.xlu0 %v67_v4 }
  0x74   :  { %v19_v6 = vpop.permute.xlu0 %18  ;;  %v27_v7 = vpop.permute.xlu1 %26 }
  0x75   :  { %v41_v10 = vmul.f32 %v33_v8, %v19_v6  ;;  %v45_v18 = vmul.f32 %v35_v12, %v27_v7 }
  0x77   :  { %v42_v16 = vadd.f32 %v63_v9, %v41_v10 }
  0x7d   :  { %v23_v14 = vpop.permute.xlu0 %22  ;;  %v31_v15 = vpop.permute.xlu1 %30 }
  0x7e   :  { %v43_v17 = vmul.f32 %v34_v11, %v23_v14  ;;  %v47_v20 = vmul.f32 %v36_v13, %v31_v15 }
  0x80   :  { %v44_v19 = vadd.f32 %v43_v17, %v42_v16 }
  0x82   :  { %v46_v21 = vadd.f32 %v45_v18, %v44_v19 }
  0x84   :  { %v48_v22 = vadd.f32 %v47_v20, %v46_v21 }
  0x86   :  { %49 = vst [vmem:[%s103_s3] sm:$0xff] %v48_v22 }

</bundles_post_ra>
